<compile_context>
chip_gen: v5e
topology: v5e:2x2
jax: 0.10.0
libtpu: 0.0.40
codegen_flags: <defaults>
</compile_context>

<pallas_src>
import functools

import jax
import jax.numpy as jnp
from jax.experimental import pallas as pl
from jax.experimental.pallas import tpu as pltpu


def _round_up(x, m):
    return (x + m - 1) // m * m


# ---------------------------------------------------------------------------
# Kernel body
# ---------------------------------------------------------------------------
def _composite_kernel(x_ref, w_ref, b_ref,
                      cls_ref, reg_ref, spr_ref, scl_ref,
                      *, nf, offs, dilation, apply_class_sigmoid, compute_dtype):
    # x_ref: (C, tn)        w_ref: (O_pad, C)      b_ref: (O_pad, 1) f32
    # outputs: cls (nf, tn), reg (2nf, tn), spread (nf, tn), scale (nf, tn)
    xb = x_ref[...]
    wb = w_ref[...]
    if compute_dtype is not None:
        # In-kernel cast: stays in VMEM/vregs, no extra HBM pass.
        xb = xb.astype(compute_dtype)
        wb = wb.astype(compute_dtype)

    # Fused 1x1 conv for all four heads: (O_pad, C) @ (C, tn), f32 accumulate.
    y = jnp.dot(wb, xb, preferred_element_type=jnp.float32)
    y = y + b_ref[...]                       # (O_pad, tn) + (O_pad, 1) lane-broadcast

    # Group offsets are multiples of 8 -> sublane-aligned slices, full-sublane
    # oriented stores (no cross-sublane shifts).
    # NOTE: if bundle dumps ever show vreg spills for very large tn, process this
    # epilogue per 512-lane chunk instead of on the full (O_pad, tn) value.
    o_cls, o_reg, o_spr, o_scl = offs
    cls = y[o_cls:o_cls + nf, :]
    if apply_class_sigmoid:                  # module sets apply_class_sigmoid=True
        cls = jax.nn.sigmoid(cls)
    cls_ref[...] = cls.astype(cls_ref.dtype)
    reg_ref[...] = (y[o_reg:o_reg + 2 * nf, :] * jnp.float32(dilation)).astype(reg_ref.dtype)
    spr_ref[...] = y[o_spr:o_spr + nf, :].astype(spr_ref.dtype)
    scl_ref[...] = jnp.maximum(y[o_scl:o_scl + nf, :], 0.0).astype(scl_ref.dtype)


# ---------------------------------------------------------------------------
# VMEM budgeting / tile selection
# ---------------------------------------------------------------------------
def _vmem_budget_bytes():
    """Generation-aware scoped-VMEM budget (v5e/v6e: 128 MiB, v7x: 64 MiB physical)."""
    try:
        info = pltpu.get_tpu_info()
        cap = getattr(info, "vmem_capacity_bytes", None)
        if cap:
            return int(cap * 0.80)
    except Exception:
        pass
    return 48 << 20   # conservative fallback that is safe on every generation


def _estimate_vmem_bytes(C, O_pad, nf, tn, x_isz, o_isz, c_isz):
    """Corrected estimate: sublane packing per dtype, real weight lane width,
    2x for pipelined input/output blocks, 1x for resident weight/bias."""
    def sub(itemsize):
        return {4: 8, 2: 16, 1: 32}.get(itemsize, 8)
    x_blk = _round_up(C, sub(x_isz)) * tn * x_isz
    o_blk = (3 * _round_up(nf, sub(o_isz)) + _round_up(2 * nf, sub(o_isz))) * tn * o_isz
    w_blk = _round_up(O_pad, 8) * _round_up(C, 128) * 4           # f32, single-buffered
    b_blk = _round_up(O_pad, 8) * 128 * 4
    acc = _round_up(O_pad, 8) * tn * 4                            # f32 matmul result
    cast_tmp = _round_up(C, sub(c_isz)) * tn * c_isz              # in-kernel bf16 x copy
    est = 2 * (x_blk + o_blk) + w_blk + b_blk + acc + cast_tmp
    return int(est * 1.15) + (4 << 20)                            # headroom + compiler scratch


def _choose_tn(HW, B, C, O_pad, nf, tn_max, x_isz, o_isz, c_isz, budget):
    cap = min(_round_up(max(tn_max, 128), 128), _round_up(HW, 128))
    tn = cap
    while tn > 128 and _estimate_vmem_bytes(C, O_pad, nf, tn, x_isz, o_isz, c_isz) > budget:
        tn -= 128
    # TODO(synk): for very large C on v7x (64 MiB VMEM) where even tn=128 does not
    # fit, add a C-reduction grid axis ("arbitrary", last) with an f32 accumulator.
    if B == 1 and HW > 128:
        # Keep >= 2 spatial blocks so both v7x TensorCores get work.
        tn = min(tn, max(_round_up(pl.cdiv(HW, 2), 128), 128))
    if tn >= HW:
        tn = HW           # full-extent block: exempt from the 128-multiple rule
    return tn


# ---------------------------------------------------------------------------
# Wrapper
# ---------------------------------------------------------------------------
def composite_field_forward(x, w_all, b_all, *, n_fields, dilation=1,
                            apply_class_sigmoid=True, tn_max=4096,
                            compute_dtype=jnp.bfloat16, out_dtype=None):
    """CompositeField forward (kernel_size=1, padding=0, dropout p=0, quad=0).

    x:      (B, C, H, W) NCHW (kept as-is; no pad / transpose in the wrapper).
    w_all:  (5*nf, C) fused 1x1-conv weight, rows ordered
            [class (nf) | reg (2*nf) | reg_spread (nf) | scale (nf)].
    b_all:  (5*nf,)   fused bias, same ordering.
    compute_dtype: dtype the matmul operands are cast to *inside* the kernel
            (None => keep the input dtype; accumulation is always f32).
    """
    B, C, H, W = x.shape
    nf = n_fields
    O, Cw = w_all.shape
    assert Cw == C and O == 5 * nf

    out_dtype = x.dtype if out_dtype is None else out_dtype
    HW = H * W
    x3 = x.reshape(B, C, HW)       # free view of contiguous NCHW

    # Pad each head group of the fused weight/bias to an 8-row (f32 sublane)
    # boundary; zero rows contribute nothing and are never read back.
    sizes = [nf, 2 * nf, nf, nf]                     # class, reg, spread, scale
    padded = [_round_up(s, 8) for s in sizes]
    offs = [0]
    for p in padded[:-1]:
        offs.append(offs[-1] + p)
    O_pad = sum(padded)
    parts_w, parts_b, src = [], [], 0
    for s, p in zip(sizes, padded):
        parts_w.append(w_all[src:src + s].astype(jnp.float32))
        parts_b.append(b_all[src:src + s].astype(jnp.float32))
        if p > s:
            parts_w.append(jnp.zeros((p - s, C), jnp.float32))
            parts_b.append(jnp.zeros((p - s,), jnp.float32))
        src += s
    w_pad = jnp.concatenate(parts_w, axis=0)                     # (O_pad, C) f32
    b_pad = jnp.concatenate(parts_b, axis=0).reshape(O_pad, 1)   # (O_pad, 1) f32

    # Generation-aware tile / VMEM-limit selection.
    budget = _vmem_budget_bytes()
    x_isz = jnp.dtype(x.dtype).itemsize
    o_isz = jnp.dtype(out_dtype).itemsize
    c_isz = jnp.dtype(compute_dtype).itemsize if compute_dtype is not None else x_isz
    tn = _choose_tn(HW, B, C, O_pad, nf, tn_max, x_isz, o_isz, c_isz, budget)
    n_j = pl.cdiv(HW, tn)
    est = _estimate_vmem_bytes(C, O_pad, nf, tn, x_isz, o_isz, c_isz)
    vmem_limit = int(min(budget, max(est, 32 << 20)))

    kernel = functools.partial(_composite_kernel, nf=nf, offs=tuple(offs),
                               dilation=dilation,
                               apply_class_sigmoid=apply_class_sigmoid,
                               compute_dtype=compute_dtype)

    def _const_spec(shape):
        # Weight/bias never change across the grid -> single-buffer them when the
        # installed jax supports pipeline_mode (frees VMEM for a bigger tile).
        try:
            return pl.BlockSpec(shape, lambda b, j: (0, 0),
                                pipeline_mode=pl.Buffered(1))
        except (TypeError, AttributeError):
            return pl.BlockSpec(shape, lambda b, j: (0, 0))

    cls, reg, spr, scl = pl.pallas_call(
        kernel,
        out_shape=(
            jax.ShapeDtypeStruct((B, nf, HW), out_dtype),
            jax.ShapeDtypeStruct((B, 2 * nf, HW), out_dtype),
            jax.ShapeDtypeStruct((B, nf, HW), out_dtype),
            jax.ShapeDtypeStruct((B, nf, HW), out_dtype),
        ),
        grid=(B, n_j),
        in_specs=[
            pl.BlockSpec((None, C, tn), lambda b, j: (b, 0, j)),   # x (batch squeezed)
            _const_spec((O_pad, C)),                               # fused weight (resident)
            _const_spec((O_pad, 1)),                               # fused bias (resident)
        ],
        out_specs=(
            pl.BlockSpec((None, nf, tn), lambda b, j: (b, 0, j)),
            pl.BlockSpec((None, 2 * nf, tn), lambda b, j: (b, 0, j)),
            pl.BlockSpec((None, nf, tn), lambda b, j: (b, 0, j)),
            pl.BlockSpec((None, nf, tn), lambda b, j: (b, 0, j)),
        ),
        compiler_params=pltpu.CompilerParams(
            dimension_semantics=("parallel", "parallel"),          # shard over 2 TCs on v7x
            vmem_limit_bytes=vmem_limit),
    )(x3, w_pad, b_pad)

    # Outputs are already exact-size NCHW; these reshapes are views (no HBM pass).
    # NOTE: reg rows are assumed field-major (x0,y0,x1,y1,...) like the fused
    # PyTorch Conv2d output; verify channel ordering when porting checkpoints.
    class_x = cls.reshape(B, nf, H, W)
    reg_x = reg.reshape(B, nf, 2, H, W)
    reg_x_spread = spr.reshape(B, nf, H, W)
    scale_x = scl.reshape(B, nf, H, W)

    # dropout(p=0.0) is identity; _quad = 0 so no PixelShuffle dequad step.
    # TODO(synk): quad > 0 (PixelShuffle dequad) path not implemented (defaults off).
    return [class_x, reg_x, reg_x_spread, scale_x]


# ---------------------------------------------------------------------------
# Pure-JAX reference and parameter init (for the self-test)
# ---------------------------------------------------------------------------
def composite_field_reference(x, w_all, b_all, *, n_fields, dilation=1):
    """Pure-JAX f32 reference (1x1 convs) for correctness checking."""
    B, C, H, W = x.shape
    nf = n_fields
    y = jnp.einsum('bchw,oc->bohw', x, w_all) + b_all[None, :, None, None]
    class_x = jax.nn.sigmoid(y[:, 0:nf])
    reg_x = (y[:, nf:3 * nf] * dilation).reshape(B, nf, 2, H, W)
    reg_x_spread = y[:, 3 * nf:4 * nf]
    scale_x = jnp.maximum(y[:, 4 * nf:5 * nf], 0.0)
    return [class_x, reg_x, reg_x_spread, scale_x]


def init_params(key, in_features, n_fields, kernel_size=1):
    """Deterministic Conv2d-like init; all 1x1 convs fused into (O, C) weight."""
    nf = n_fields
    out_sizes = [nf, 2 * nf, nf, nf]   # class, reg, reg_spread, scale
    fan_in = in_features * kernel_size * kernel_size
    bound = 1.0 / float(fan_in) ** 0.5
    ws, bs = [], []
    for o in out_sizes:
        key, kw, kb = jax.random.split(key, 3)
        ws.append(jax.random.uniform(kw, (o, in_features), jnp.float32, -bound, bound))
        bs.append(jax.random.uniform(kb, (o,), jnp.float32, -bound, bound))
    return jnp.concatenate(ws, axis=0), jnp.concatenate(bs, axis=0)


if __name__ == "__main__":
    # head_name = "pif4": n_fields=4, n_confidences=1, n_vectors=1, n_scales=1
    B, C, H, W = 2, 4, 16, 16
    n_fields = 4
    dilation = 1

    key = jax.random.PRNGKey(0)
    kx, kp = jax.random.split(key)
    x = jax.random.normal(kx, (B, C, H, W), jnp.float32)
    w_all, b_all = init_params(kp, C, n_fields)

    outs = composite_field_forward(x, w_all, b_all,
                                   n_fields=n_fields, dilation=dilation)
    outs = jax.block_until_ready(outs)

    class_x, reg_x, reg_x_spread, scale_x = outs
    assert class_x.shape == (B, n_fields, H, W)
    assert reg_x.shape == (B, n_fields, 2, H, W)
    assert reg_x_spread.shape == (B, n_fields, H, W)
    assert scale_x.shape == (B, n_fields, H, W)
    # activation sanity
    assert bool(jnp.all(class_x >= 0.0) & jnp.all(class_x <= 1.0))
    assert bool(jnp.all(scale_x >= 0.0))

    # numerical check vs pure-JAX f32 reference (tolerance covers the in-kernel
    # bf16 matmul with f32 accumulation at C=4)
    refs = composite_field_reference(x, w_all, b_all,
                                     n_fields=n_fields, dilation=dilation)
    for out, ref in zip(outs, refs):
        assert bool(jnp.allclose(out, ref, atol=2e-2, rtol=2e-2))

    print("KERNEL_OK")
</pallas_src>

<mosaic_0001>
module attributes {stable_mosaic.version = 11 : i64} {
  func.func @_composite_kernel(%arg0: i32, %arg1: i32, %arg2: memref<1x4x256xf32, #tpu.memory_space<vmem>>, %arg3: memref<32x4xf32, #tpu.memory_space<vmem>>, %arg4: memref<32x1xf32, #tpu.memory_space<vmem>>, %arg5: memref<1x4x256xf32, #tpu.memory_space<vmem>>, %arg6: memref<1x8x256xf32, #tpu.memory_space<vmem>>, %arg7: memref<1x4x256xf32, #tpu.memory_space<vmem>>, %arg8: memref<1x4x256xf32, #tpu.memory_space<vmem>>) attributes {dimension_semantics = [#tpu.dimension_semantics<parallel>, #tpu.dimension_semantics<parallel>], iteration_bounds = array<i64: 2, 1>, scalar_prefetch = 0 : i64, scratch_operands = 0 : i64, tpu.core_type = #tpu.core_type<tc>, window_params = [{transform_indices = @transform_0, window_bounds = array<i64: 1, 4, 256>}, {pipeline_mode = #tpu.pipeline_mode<synchronous>, transform_indices = @transform_1, window_bounds = array<i64: 32, 4>}, {pipeline_mode = #tpu.pipeline_mode<synchronous>, transform_indices = @transform_2, window_bounds = array<i64: 32, 1>}, {transform_indices = @transform_3, window_bounds = array<i64: 1, 4, 256>}, {transform_indices = @transform_4, window_bounds = array<i64: 1, 8, 256>}, {transform_indices = @transform_5, window_bounds = array<i64: 1, 4, 256>}, {transform_indices = @transform_6, window_bounds = array<i64: 1, 4, 256>}]} {
    %c0 = arith.constant 0 : index
    %c0_0 = arith.constant 0 : index
    %c0_1 = arith.constant 0 : index
    %0 = vector.load %arg2[%c0, %c0_0, %c0_1] : memref<1x4x256xf32, #tpu.memory_space<vmem>>, vector<1x4x256xf32>
    %1 = vector.shape_cast %0 : vector<1x4x256xf32> to vector<4x256xf32>
    %c0_2 = arith.constant 0 : index
    %c0_3 = arith.constant 0 : index
    %2 = vector.load %arg3[%c0_2, %c0_3] : memref<32x4xf32, #tpu.memory_space<vmem>>, vector<32x4xf32>
    %3 = arith.truncf %1 : vector<4x256xf32> to vector<4x256xbf16>
    %4 = arith.truncf %2 : vector<32x4xf32> to vector<32x4xbf16>
    %cst = arith.constant dense<0.000000e+00> : vector<32x256xf32>
    %5 = tpu.matmul %4, %3, %cst {dimension_numbers = #tpu.dot_dimension_numbers<[1], [0], [0], [1], [0, 0, 1, 1], [], []>} : vector<32x4xbf16>, vector<4x256xbf16>, vector<32x256xf32> -> vector<32x256xf32>
    %c0_4 = arith.constant 0 : index
    %c0_5 = arith.constant 0 : index
    %6 = vector.load %arg4[%c0_4, %c0_5] : memref<32x1xf32, #tpu.memory_space<vmem>>, vector<32x1xf32>
    %7 = vector.broadcast %6 : vector<32x1xf32> to vector<32x256xf32>
    %8 = arith.addf %5, %7 : vector<32x256xf32>
    %9 = vector.extract_strided_slice %8 {offsets = [0, 0], sizes = [4, 256], strides = [1, 1]} : vector<32x256xf32> to vector<4x256xf32>
    %10 = arith.negf %9 : vector<4x256xf32>
    %11 = math.exp %10 : vector<4x256xf32>
    %cst_6 = arith.constant 1.000000e+00 : f32
    %12 = vector.broadcast %cst_6 : f32 to vector<4x256xf32>
    %13 = arith.addf %12, %11 : vector<4x256xf32>
    %14 = arith.divf %12, %13 : vector<4x256xf32>
    %c0_7 = arith.constant 0 : index
    %c0_8 = arith.constant 0 : index
    %c0_9 = arith.constant 0 : index
    %15 = vector.load %arg5[%c0_7, %c0_8, %c0_9] : memref<1x4x256xf32, #tpu.memory_space<vmem>>, vector<1x4x256xf32>
    %16 = vector.shape_cast %15 : vector<1x4x256xf32> to vector<4x256xf32>
    %17 = vector.shape_cast %14 : vector<4x256xf32> to vector<1x4x256xf32>
    tpu.vector_store %arg5[%c0_7, %c0_8, %c0_9], %17 {strides = array<i32>} : memref<1x4x256xf32, #tpu.memory_space<vmem>>, vector<1x4x256xf32>,
    %18 = vector.extract_strided_slice %8 {offsets = [8, 0], sizes = [8, 256], strides = [1, 1]} : vector<32x256xf32> to vector<8x256xf32>
    %cst_10 = arith.constant 1.000000e+00 : f32
    %19 = vector.broadcast %cst_10 : f32 to vector<8x256xf32>
    %20 = arith.mulf %18, %19 : vector<8x256xf32>
    %c0_11 = arith.constant 0 : index
    %c0_12 = arith.constant 0 : index
    %c0_13 = arith.constant 0 : index
    %21 = vector.load %arg6[%c0_11, %c0_12, %c0_13] : memref<1x8x256xf32, #tpu.memory_space<vmem>>, vector<1x8x256xf32>
    %22 = vector.shape_cast %21 : vector<1x8x256xf32> to vector<8x256xf32>
    %23 = vector.shape_cast %20 : vector<8x256xf32> to vector<1x8x256xf32>
    tpu.vector_store %arg6[%c0_11, %c0_12, %c0_13], %23 {strides = array<i32>} : memref<1x8x256xf32, #tpu.memory_space<vmem>>, vector<1x8x256xf32>,
    %24 = vector.extract_strided_slice %8 {offsets = [16, 0], sizes = [4, 256], strides = [1, 1]} : vector<32x256xf32> to vector<4x256xf32>
    %c0_14 = arith.constant 0 : index
    %c0_15 = arith.constant 0 : index
    %c0_16 = arith.constant 0 : index
    %25 = vector.load %arg7[%c0_14, %c0_15, %c0_16] : memref<1x4x256xf32, #tpu.memory_space<vmem>>, vector<1x4x256xf32>
    %26 = vector.shape_cast %25 : vector<1x4x256xf32> to vector<4x256xf32>
    %27 = vector.shape_cast %24 : vector<4x256xf32> to vector<1x4x256xf32>
    tpu.vector_store %arg7[%c0_14, %c0_15, %c0_16], %27 {strides = array<i32>} : memref<1x4x256xf32, #tpu.memory_space<vmem>>, vector<1x4x256xf32>,
    %28 = vector.extract_strided_slice %8 {offsets = [24, 0], sizes = [4, 256], strides = [1, 1]} : vector<32x256xf32> to vector<4x256xf32>
    %cst_17 = arith.constant 0.000000e+00 : f32
    %29 = vector.broadcast %cst_17 : f32 to vector<4x256xf32>
    %30 = arith.maximumf %28, %29 : vector<4x256xf32>
    %c0_18 = arith.constant 0 : index
    %c0_19 = arith.constant 0 : index
    %c0_20 = arith.constant 0 : index
    %31 = vector.load %arg8[%c0_18, %c0_19, %c0_20] : memref<1x4x256xf32, #tpu.memory_space<vmem>>, vector<1x4x256xf32>
    %32 = vector.shape_cast %31 : vector<1x4x256xf32> to vector<4x256xf32>
    %33 = vector.shape_cast %30 : vector<4x256xf32> to vector<1x4x256xf32>
    tpu.vector_store %arg8[%c0_18, %c0_19, %c0_20], %33 {strides = array<i32>} : memref<1x4x256xf32, #tpu.memory_space<vmem>>, vector<1x4x256xf32>,
    return
  }
  func.func @transform_0(%arg0: i32, %arg1: i32) -> (i32, i32, i32) {
    %c0_i32 = arith.constant 0 : i32
    %c0_i32_0 = arith.constant 0 : i32
    return %arg0, %c0_i32, %arg1 : i32, i32, i32
  }
  func.func @transform_1(%arg0: i32, %arg1: i32) -> (i32, i32) {
    %c0_i32 = arith.constant 0 : i32
    %c0_i32_0 = arith.constant 0 : i32
    %c0_i32_1 = arith.constant 0 : i32
    return %c0_i32, %c0_i32_0 : i32, i32
  }
  func.func @transform_2(%arg0: i32, %arg1: i32) -> (i32, i32) {
    %c0_i32 = arith.constant 0 : i32
    %c0_i32_0 = arith.constant 0 : i32
    %c0_i32_1 = arith.constant 0 : i32
    return %c0_i32, %c0_i32_0 : i32, i32
  }
  func.func @transform_3(%arg0: i32, %arg1: i32) -> (i32, i32, i32) {
    %c0_i32 = arith.constant 0 : i32
    %c0_i32_0 = arith.constant 0 : i32
    return %arg0, %c0_i32, %arg1 : i32, i32, i32
  }
  func.func @transform_4(%arg0: i32, %arg1: i32) -> (i32, i32, i32) {
    %c0_i32 = arith.constant 0 : i32
    %c0_i32_0 = arith.constant 0 : i32
    return %arg0, %c0_i32, %arg1 : i32, i32, i32
  }
  func.func @transform_5(%arg0: i32, %arg1: i32) -> (i32, i32, i32) {
    %c0_i32 = arith.constant 0 : i32
    %c0_i32_0 = arith.constant 0 : i32
    return %arg0, %c0_i32, %arg1 : i32, i32, i32
  }
  func.func @transform_6(%arg0: i32, %arg1: i32) -> (i32, i32, i32) {
    %c0_i32 = arith.constant 0 : i32
    %c0_i32_0 = arith.constant 0 : i32
    return %arg0, %c0_i32, %arg1 : i32, i32, i32
  }
}

</mosaic_0001>

<bundles_post_ra>
// kernel: tpu_custom_call.1
= control target key start
LH: loop header
LB: loop body
LE: loop exit
PB: predicated region body
PF: predicated region fallthrough
CT: control target
= control target key end

     0   :  { %s1298_s0 = inlined_call_operand.vmem [shape: f32[2,4,256], index: 0, kind: input, shape index: {}]   ;;  %s1299_s1 = inlined_call_operand.vmem [shape: f32[32,4], index: 1, kind: input, shape index: {}]   ;;  %s1300_s2 = inlined_call_operand.vmem [shape: f32[32,1], index: 2, kind: input, shape index: {}]   ;;  %s1301_s3 = inlined_call_operand.hbm [shape: f32[2,4,256], index: 3, kind: output, shape index: {0}]   ;;  %s1302_s4 = inlined_call_operand.hbm [shape: f32[2,8,256], index: 4, kind: output, shape index: {1}]   ;;  %s1303_s5 = inlined_call_operand.hbm [shape: f32[2,4,256], index: 5, kind: output, shape index: {2}]   ;;  %s1304_s6 = inlined_call_operand.hbm [shape: f32[2,4,256], index: 6, kind: output, shape index: {3}]  }
   0x1   :  { %1310 = sst [smem:[#allocation14_spill]] %s1298_s0 }
   0x2   :  { %1311 = sst [smem:[#allocation15_spill]] %s1299_s1 }
   0x3   :  { %12 = vsyncpa [#allocation3], 0 }
   0x4   :  { %14 = vsyncpa [#allocation3 + $0x1], 0 }
   0x5   :  { %15 = vsyncpa [#allocation5], 0 }
   0x6   :  { %17 = vsyncpa [#allocation5 + $0x1], 0 }
   0x7   :  { %18 = vsyncpa [#allocation8], 0 }
   0x8   :  { %20 = vsyncpa [#allocation8 + $0x1], 0  ;;  %s1064_s21 = smov 0   ;;  %s1066_s22 = smov 0  }
   0x9   :  { %s1068_s23 = smov 0   ;;  %s1070_s24 = smov 0  }
   0xa   :  { %s1072_s25 = smov 0   ;;  %s1074_s26 = smov 0  }
   0xb LB: > { %s737_s27 = sadd.s32 4294967295, %s1026_s26   ;;  %s1305_s28 = sadd.s32 4294967294, %s1026_s26   ;;  %s1026_s26 = sphi %s1074_s26, %s26_s26   ;;  %s1022_s25 = sphi %s1072_s25, %s1331_s25   ;;  %s1018_s24 = sphi %s1070_s24, %s1330_s24   ;;  %s1014_s23 = sphi %s1068_s23, %s1329_s23   ;;  %s1010_s22 = sphi %s1066_s22, %s1328_s22   ;;  %s1006_s21 = sphi %s1064_s21, %s1327_s21  }
   0xc   : > { %s38_s29 = sadd.s32 1, %s1022_s25  ;;  %s117_s30 = sadd.s32 1, %s1014_s23 }
   0xd   : > { %p40_p0 = scmp.ge.s32.totalorder %s38_s29, 2  ;;  %p127_p1 = scmp.ne.s32.totalorder %s1014_s23, %s1010_s22 }
   0xe   : > { %p128_p2 = scmp.eq.s32.totalorder %s737_s27, 1  ;;  %p133_p3 = scmp.ne.s32.totalorder %s1010_s22, %s1006_s21 }
   0xf   : > { %s1333_s29 = smov (%p40_p0, %s38_s29), 0  ;;  %p134_p5 = scmp.eq.s32.totalorder %s1305_s28, 1 }
  0x10   : > { %p1106_p4 = por %p128_p2, %p127_p1  ;;  %s112_s8 = ssub.s32 %s1022_s25, %s1333_s29 }
  0x11   : > { %p741_p6 = scmp.ge.s32.totalorder %s1026_s26, 1  ;;  %p115_p7 = scmp.eq.s32.totalorder %s112_s8, 0 }
  0x12   : > { %p1115_p8 = por %p134_p5, %p133_p3  ;;  %p255_p9 = scmp.lt.s32.totalorder %s1026_s26, 3 }
  0x13   : > { %s1121_s10 = scalar_select %p115_p7, %s1014_s23, %s117_s30  }
  0x14   : > { %p256_p10 = pnand %p741_p6, %p255_p9 }
  0x16   : > { %259 = sbr.rel (%p256_p10) target bundleno = 239 (0xef), region = 32 }
  0x1b   : > { %p305_p11 = scmp.lt.s32.totalorder %s1018_s24, 1  ;;  %v334_v0 = vld [vmem:[%s1300_s2] sm:$0xff]  ;;  %v336_v1 = vld [vmem:[%s1300_s2 + $0x10] sm:$0xff]  ;;  %v1028_v2 = vmov 0   ;;  %s1314_s0 = sld [smem:[#allocation14_spill]]  ;;  %v337_v4 = vld [vmem:[%s1300_s2 + $0x18] sm:$0xff] }
  0x1c   : > { %846 = vset.pattern.permute.xlu0 %v1028_v2  ;;  %847 = vset.pattern.permute.xlu1 %v1028_v2  ;;  %v335_v5 = vld [vmem:[%s1300_s2 + $0x8] sm:$0xff]  ;;  %s1315_s1 = sld [smem:[#allocation15_spill]]  ;;  %vm365_vm0 = vcmask 1041408   ;;  %vm358_vm1 = vcmask 31744   ;;  %s1153_s20 = sand.u32 1, %s1010_s22   ;;  %vm451_vm2 = vcmask 1043456  }
  0x1d   : > { %s306_s15 = scalar_select %p305_p11, %s1018_s24, 1  ;;  %340 = vperm.xlu0 %846, %v334_v0   ;;  %350 = vperm.xlu1 %847, %v336_v1  }
  0x1e   : > { %s743_s30 = sshll.u32 %s1153_s20, 4  ;;  %s770_s8 = sshll.u32 %s1018_s24, 4 }
  0x1f   : > { %s768_s16 = sshll.u32 %s306_s15, 3  ;;  %s1158_s11 = sshll.u32 %s1018_s24, 3 }
  0x20   : > { %s517_s14 = scalar_lea.hbm %s1302_s4, %s770_s8  ;;  %s1164_s15 = sshll.u32 %s1153_s20, 3 }
  0x21   : > { %s312_s19 = scalar_lea.vmem %s1314_s0, %s768_s16  ;;  %s534_s18 = scalar_lea.hbm %s1303_s5, %s1158_s11 }
  0x22   : > { %v319_v3 = vld [vmem:[%s312_s19] sm:$0xff]  ;;  %v321_v7 = vld [vmem:[%s1315_s1 + $0x8] sm:$0xff]  ;;  %v322_v8 = vld [vmem:[%s1315_s1 + $0x10] sm:$0xff]  ;;  %s1172_s24 = sand.u32 1, %s737_s27   ;;  %s289_s19 = scalar_lea.vmem [#allocation4], %s743_s30 }
  0x23   : > { %325 = vst [vmem:[#allocation1] ss:$2 sm:$0xff] %v319_v3  ;;  %v320_v6 = vld [vmem:[%s1315_s1] sm:$0xff]  ;;  %v323_v9 = vld [vmem:[%s1315_s1 + $0x18] sm:$0xff]  ;;  %s519_s28 = sshll.u32 %s289_s19, 4  ;;  %s521_s12 = sshll.u32 %s517_s14, 4  ;;  %s520_s28 = int_to_ptr.vmem [resolvable:$true] %s519_s28  ;;  %s522_s12 = int_to_ptr.hbm [resolvable:$true] %s521_s12 }
  0x24   : > { %v332_v16 = vpack.c.bf16 %v321_v7, %v320_v6  ;;  %v333_v17 = vpack.c.bf16 %v323_v9, %v322_v8  ;;  %s1307_s8 = scalar_lea.vmem [#allocation6], %s1164_s15  ;;  %s1179_s16 = sshll.u32 %s534_s18, 4 }
  0x25   : > { %355 = vperm.xlu0 %846, %v337_v4   ;;  %345 = vperm.xlu1 %847, %v335_v5   ;;  %s1177_s13 = sshll.u32 %s1307_s8, 4  ;;  %1317 = sst [smem:[#allocation13_spill]] %s1179_s16 }
  0x26   : > { %1316 = sst [smem:[#allocation12_spill]] %s1177_s13  ;;  %s477_s27 = scalar_lea.sflag [#allocation5], %s1172_s24 }
  0x27   : > { %s870_s30 = sshra.s32 %s522_s12, 4  ;;  %s876_s13 = scalar_lea.hbm %s1302_s4, 32  ;;  %s871_s30 = int_to_ptr.hbm [resolvable:$true] %s870_s30 }
  0x28   : > { %s872_s14 = scalar_lea.hbm %s871_s30, 16  ;;  %p877_p1 = scmp.lt.s32.totalorder %s871_s30, %s1302_s4 }
  0x29   : > { %p873_p12 = scmp.ne.s32.totalorder %s871_s30, %s872_s14  ;;  %p878_p2 = scmp.lt.s32.totalorder %s876_s13, %s872_s14 }
  0x2a   : > { %v326_v10 = vld.sshfl [vmem:[#allocation1] sm:$0xff pattern:$0x75316420]  ;;  %v327_v11 = vld.sshfl [vmem:[#allocation1 + $0x8] sm:$0xff pattern:$0x75316420] }
  0x2b   : > { %v330_v12 = vpack.c.bf16 %v326_v10, %v326_v10  ;;  %v331_v13 = vpack.c.bf16 %v327_v11, %v327_v11  ;;  %p874_p13 = pnand %p873_p12, %p1106_p4  ;;  %p879_p3 = por %p878_p2, %p877_p1 }
  0x2d   : > { %v367_v14 = vsel %vm365_vm0, %v330_v12, 0  ;;  %v370_v15 = vsel %vm365_vm0, %v331_v13, 0  ;;  %p875_p0 = pneg %p874_p13 }
  0x2e   : > { %379 = vmatpush.bf16.msra.mxu0 %v367_v14  ;;  %773 = vmatpush.bf16.msra.mxu2 %v367_v14 }
  0x2f   : > { %398 = vmatpush.bf16.msra.mxu1 %v370_v15  ;;  %774 = vmatpush.bf16.msra.mxu3 %v370_v15  ;;  %p880_p5 = pnand %p879_p3, %p875_p0 }
  0x31   : > { %748 = vmatmul.msk.bf16.vlgmr.msra.gmra.mxu0 %vm358_vm1, %v332_v16  ;;  %749 = vmatmul.msk.bf16.vlgmr.msra.gmra.mxu2 %vm358_vm1, %v333_v17 }
  0x32   : > { %750 = vmatmul.msk.bf16.vlgmr.msra.gmra.mxu1 %vm358_vm1, %v332_v16  ;;  %751 = vmatmul.msk.bf16.vlgmr.msra.gmra.mxu3 %vm358_vm1, %v333_v17 }
  0x8f   : > { %v351_v18 = vpop.permute.xlu1 %350  ;;  %v341_v19 = vpop.permute.xlu0 %340 }
  0x97   : > { %v346_v27 = vpop.permute.xlu1 %345 }
  0xae   : > { %v381_v20 = vpop.f32.mrf.mxu0 }
  0xaf   : > { %v382_v21 = vadd.f32 %v381_v20, %v341_v19  ;;  %v400_v22 = vpop.f32.mrf.mxu1 }
  0xb0   : > { %v401_v23 = vadd.f32 %v400_v22, %v341_v19 }
  0xb1   : > { %v752_v24 = vmul.f32 -1.442695, %v382_v21 }
  0xb2   : > { %v753_v25 = vmul.f32 -1.442695, %v401_v23 }
  0xb3   : > { %848 = vpow2.f32 %v752_v24 }
  0xb4   : > { %850 = vpow2.f32 %v753_v25  ;;  %v386_v26 = vpop.f32.mrf.mxu2 }
  0xb5   : > { %v405_v28 = vpop.f32.mrf.mxu3  ;;  %v387_v29 = vadd.f32 %v386_v26, %v351_v18 }
  0xb6   : > { %v406_v30 = vadd.f32 %v405_v28, %v351_v18  ;;  %v383_v31 = vpop.f32.mrf.mxu0 }
  0xb7   : > { %v384_v32 = vadd.f32 %v383_v31, %v346_v27  ;;  %v402_v33 = vpop.f32.mrf.mxu1 }
  0xb8   : > { %v459_v34 = vrot.slane %v406_v30, 4  ;;  %v403_v35 = vadd.f32 %v402_v33, %v346_v27 }
  0xb9   : > { %v849_v36 = vpop.eup %848  ;;  %455 = vst [vmem:[%s289_s19] sm:$0xff] %v384_v32 }
  0xba   : > { %v851_v37 = vpop.eup %850  ;;  %v1183_v38 = vadd.f32 1.0, %v849_v36  ;;  %v460_v39 = vsel %vm451_vm2, %v387_v29, %v459_v34  ;;  %456 = vst [vmem:[%s289_s19 + $0x8] sm:$0xff] %v403_v35 }
  0xbb   : > { %v1186_v40 = vadd.f32 1.0, %v851_v37 }
  0xbc   : > { %883 = shalt.err (!%p880_p5)
}
  0xbd   : > { %s1318_s19 = sld [smem:[#allocation13_spill]]  ;;  %s1319_s0 = scalar_lea.vmem [#allocation6], %s1164_s15  ;;  %852 = vrcp.f32 %v1183_v38  ;;  %v388_v41 = vpop.f32.mrf.mxu2 }
  0xbe   : > { %776 = dma.vmem_to_hbm [thread:$0]  (%p1106_p4), %s520_s28, 256, %s522_s12, %s477_s27   ;;  %462 = vst [vmem:[%s1319_s0] sm:$0xff] %v460_v39 }
  0xbf   : > { %s904_s14 = scalar_lea.hbm %s1303_s5, 16 }
  0xc3   : > { %s1320_s17 = int_to_ptr.hbm [resolvable:$true] %s1318_s19 }
  0xc4   : > { %s898_s8 = sshra.s32 %s1320_s17, 4  ;;  %s899_s8 = int_to_ptr.hbm [resolvable:$true] %s898_s8 }
  0xc5   : > { %s900_s13 = scalar_lea.hbm %s899_s8, 8  ;;  %p905_p10 = scmp.lt.s32.totalorder %s899_s8, %s1303_s5 }
  0xc6   : > { %p901_p6 = scmp.ne.s32.totalorder %s899_s8, %s900_s13  ;;  %p906_p11 = scmp.lt.s32.totalorder %s904_s14, %s900_s13 }
  0xc8   : > { %p902_p7 = pnand %p901_p6, %p1106_p4  ;;  %p907_p12 = por %p906_p11, %p905_p10 }
  0xca   : > { %p903_p9 = pneg %p902_p7 }
  0xcc   : > { %p908_p13 = pnand %p907_p12, %p903_p9 }
  0xce   : > { %911 = shalt.err (!%p908_p13)
}
  0xcf   : > { %s1321_s0 = smov %s1320_s17  ;;  %s1322_s28 = sld [smem:[#allocation12_spill]]  ;;  %v356_v42 = vpop.permute.xlu0 %355  ;;  %854 = vrcp.f32 %v1186_v40  ;;  %v407_v43 = vpop.f32.mrf.mxu3 }
  0xd0   : > { %s551_s8 = scalar_lea.hbm %s1304_s6, %s1158_s11  ;;  %v389_v44 = vadd.f32 %v388_v41, %v356_v42  ;;  %v408_v45 = vadd.f32 %v407_v43, %v356_v42  ;;  %s303_s24 = scalar_lea.vmem [#allocation7], %s1164_s15  ;;  %v853_v47 = vpop.eup %852 }
  0xd1   : > { %s1228_s13 = sshll.u32 %s303_s24, 4  ;;  %s555_s19 = sshll.u32 %s551_s8, 4  ;;  %v419_v51 = vmul.f32 %v853_v47, %v1183_v38  ;;  %s554_s13 = int_to_ptr.vmem [resolvable:$true] %s1228_s13  ;;  %s556_s19 = int_to_ptr.hbm [resolvable:$true] %s555_s19 }
  0xd2   : > { %v464_v46 = vmax.f32 %v408_v45, 0.0  ;;  %v463_v48 = vmax.f32 %v389_v44, 0.0  ;;  %s926_s16 = sshra.s32 %s556_s19, 4  ;;  %s927_s16 = int_to_ptr.hbm [resolvable:$true] %s926_s16 }
  0xd3   : > { %v420_v54 = vsub.f32 1.0, %v419_v51  ;;  %s928_s30 = scalar_lea.hbm %s927_s16, 8  ;;  %p933_p3 = scmp.lt.s32.totalorder %s927_s16, %s1304_s6 }
  0xd4   : > { %v467_v49 = vrot.slane %v464_v46, 4  ;;  %p929_p0 = scmp.ne.s32.totalorder %s927_s16, %s928_s30 }
  0xd5   : > { %s1323_s12 = int_to_ptr.vmem [resolvable:$true] %s1322_s28  ;;  %v855_v50 = vpop.eup %854 }
  0xd6   : > { %777 = dma.vmem_to_hbm [thread:$0]  (%p1106_p4), %s1323_s12, 128, %s1321_s0, %s477_s27   ;;  %v434_v52 = vmul.f32 %v855_v50, %v1186_v40  ;;  %v468_v53 = vsel %vm451_vm2, %v463_v48, %v467_v49 }
  0xd7   : > { %470 = vst [vmem:[%s303_s24] sm:$0xff] %v468_v53  ;;  %s487_s27 = scalar_lea.sflag [#allocation8], %s1153_s20  ;;  %p930_p1 = pnand %p929_p0, %p1106_p4 }
  0xd8   : > { %v435_v55 = vsub.f32 1.0, %v434_v52  ;;  %s932_s0 = scalar_lea.hbm %s1304_s6, 16 }
  0xd9   : > { %p931_p2 = pneg %p930_p1  ;;  %p934_p5 = scmp.lt.s32.totalorder %s932_s0, %s928_s30 }
  0xdb   : > { %p935_p6 = por %p934_p5, %p933_p3 }
  0xdd   : > { %p936_p7 = pnand %p935_p6, %p931_p2 }
  0xdf   : > { %939 = shalt.err (!%p936_p7)
}
  0xe0   : > { %778 = dma.vmem_to_hbm [thread:$0]  (%p1106_p4), %s554_s13, 128, %s556_s19, %s487_s27   ;;  %v421_v56 = vmul.f32 %v853_v47, %v420_v54  ;;  %vm424_vm3 = vweird.f32 %v853_v47  ;;  %v444_v57 = vand.u32 2147483648, %v1186_v40  ;;  %v436_v58 = vmul.f32 %v855_v50, %v435_v55 }
  0xe1   : > { %vm439_vm4 = vweird.f32 %v855_v50  ;;  %v442_v59 = vand.u32 2147483647, %v1186_v40  ;;  %vm423_vm5 = vweird.f32 %v1183_v38  ;;  %v429_v61 = vand.u32 2147483648, %v1183_v38  ;;  %s500_s8 = scalar_lea.hbm %s1301_s3, %s1158_s11  ;;  %s282_s24 = scalar_lea.vmem [#allocation2], %s1164_s15 }
  0xe2   : > { %v422_v60 = vadd.f32 %v853_v47, %v421_v56  ;;  %vm1253_vm6 = vmor %vm423_vm5, %vm424_vm3  ;;  %v427_v63 = vand.u32 2147483647, %v1183_v38  ;;  %v437_v0 = vadd.f32 %v855_v50, %v436_v58  ;;  %vm438_vm7 = vweird.f32 %v1186_v40  ;;  %s502_s13 = sshll.u32 %s282_s24, 4  ;;  %s504_s11 = sshll.u32 %s500_s8, 4  ;;  %s503_s13 = int_to_ptr.vmem [resolvable:$true] %s502_s13  ;;  %s505_s11 = int_to_ptr.hbm [resolvable:$true] %s504_s11 }
  0xe3   : > { %vm440_vm8 = vmor %vm438_vm7, %vm439_vm4  ;;  %v445_v1 = vor.u32 1.1754944e-38, %v444_v57  ;;  %vm443_vm9 = vcmp.eq.f32.partialorder %v442_v59, 8.507059e+37  ;;  %v430_v4 = vor.u32 1.1754944e-38, %v429_v61  ;;  %s472_s19 = scalar_lea.sflag [#allocation3], %s1153_s20  ;;  %s954_s27 = sshra.s32 %s505_s11, 4  ;;  %s955_s27 = int_to_ptr.hbm [resolvable:$true] %s954_s27 }
  0xe4   : > { %v426_v2 = vsel %vm1253_vm6, %v853_v47, %v422_v60  ;;  %v441_v3 = vsel %vm440_vm8, %v855_v50, %v437_v0  ;;  %vm428_vm10 = vcmp.eq.f32.partialorder %v427_v63, 8.507059e+37  ;;  %s956_s16 = scalar_lea.hbm %s955_s27, 8  ;;  %s960_s14 = scalar_lea.hbm %s1301_s3, 16 }
  0xe5   : > { %v446_v5 = vsel %vm443_vm9, %v445_v1, %v441_v3  ;;  %v431_v7 = vsel %vm428_vm10, %v430_v4, %v426_v2  ;;  %p957_p9 = scmp.ne.s32.totalorder %s955_s27, %s956_s16  ;;  %p961_p12 = scmp.lt.s32.totalorder %s955_s27, %s1301_s3 }
  0xe6   : > { %v450_v6 = vrot.slane %v446_v5, 4  ;;  %p962_p13 = scmp.lt.s32.totalorder %s960_s14, %s956_s16 }
  0xe7   : > { %p958_p10 = pnand %p957_p9, %p1106_p4 }
  0xe8   : > { %v452_v8 = vsel %vm451_vm2, %v431_v7, %v450_v6  ;;  %p963_p0 = por %p962_p13, %p961_p12 }
  0xe9   : > { %454 = vst [vmem:[%s282_s24] sm:$0xff] %v452_v8  ;;  %p959_p11 = pneg %p958_p10 }
  0xeb   : > { %p964_p1 = pnand %p963_p0, %p959_p11 }
  0xed   : > { %967 = shalt.err (!%p964_p1)
}
  0xee   : > { %775 = dma.vmem_to_hbm [thread:$0]  (%p1106_p4), %s503_s13, 128, %s505_s11, %s472_s19  }
  0xef PF: > { %p796_p2 = scmp.ge.s32.totalorder %s1026_s26, 2  ;;  %s567_s20 = sand.u32 1, %s1006_s21  }
  0xf0   : > { %s568_s28 = scalar_lea.sflag [#allocation3], %s567_s20 }
  0xf1   : > { %p784_p3 = pnand %p796_p2, %p1115_p8 }
  0xf3   : > { %p785_p5 = pneg %p784_p3 }
  0xf5   : > { %993 = dma.done.wait (%p785_p5), %s568_s28, 128  }
  0xf6   : > { %995 = vsyncadd (%p785_p5), %s568_s28, 4294967168  ;;  %s1326_s12 = sadd.s32 4294967294, %s1026_s26  }
  0xf7   : > { %s577_s1 = sand.u32 1, %s1326_s12  }
  0xf8   : > { %s578_s17 = scalar_lea.sflag [#allocation5], %s577_s1 }
  0xf9   : > { %997 = dma.done.wait (%p785_p5), %s578_s17, 384  }
  0xfa   : > { %999 = vsyncadd (%p785_p5), %s578_s17, 4294966912  ;;  %s598_s7 = scalar_lea.sflag [#allocation8], %s567_s20 }
  0xfb   : > { %1001 = dma.done.wait (%p785_p5), %s598_s7, 128  }
  0xfc   : > { %1003 = vsyncadd (%p785_p5), %s598_s7, 4294967168  ;;  %s26_s26 = sadd.s32 1, %s1026_s26   ;;  %s1327_s21 = smov %s1010_s22 }
  0xfd   : > { %p23_p4 = scmp.ge.s32.totalorder %s26_s26, 4   ;;  %s1328_s22 = smov %s1014_s23 }
  0xfe   : > { %s1329_s23 = smov %s1121_s10  ;;  %s1330_s24 = smov %s1022_s25 }
  0xff   : > { %s1331_s25 = smov %s1333_s29  ;;  %25 = sbr.rel (!%p23_p4) target bundleno = 11 (0xb), region = 116 }
 0x104   :  { %604 = vsyncpa [#allocation3], 1 }
 0x105   :  { %606 = vsyncpa [#allocation3 + $0x1], 1 }
 0x106   :  { %607 = vsyncpa [#allocation5], 1 }
 0x107   :  { %609 = vsyncpa [#allocation5 + $0x1], 1 }
 0x108   :  { %610 = vsyncpa [#allocation8], 1 }
 0x109   :  { %612 = vsyncpa [#allocation8 + $0x1], 1 }

</bundles_post_ra>
